<compile_context>
chip_gen: v5e
topology: v5e:2x2
jax: 0.10.0
libtpu: 0.0.40
codegen_flags: <defaults>
</compile_context>

<pallas_src>
import functools

import numpy as np

import jax
import jax.numpy as jnp
from jax.experimental import pallas as pl
from jax.experimental.pallas import tpu as pltpu

try:  # fast exact Hungarian if SciPy is installed
    from scipy.optimize import linear_sum_assignment as _scipy_lsa
except Exception:  # pragma: no cover
    _scipy_lsa = None


# ----------------------------------------------------------------------------
# helpers
# ----------------------------------------------------------------------------
def _round_up(x, m):
    return ((x + m - 1) // m) * m


def _choose_query_tile(nq, target=1024):
    """Pad the query axis to a multiple of 8 (or of `target` when large)."""
    nq8 = _round_up(max(int(nq), 1), 8)
    if nq8 <= target:
        return nq8, nq8          # (nq_pad, tile) -- single tile per batch
    nq_pad = _round_up(int(nq), target)
    return nq_pad, target


# ----------------------------------------------------------------------------
# Pallas kernel: one (TM, Tpad) block of the per-batch cost matrix
# ----------------------------------------------------------------------------
def _cost_kernel(logits_ref, bbox_ref, onehot_ref, tgt_bbox_ref, out_ref, *,
                 alpha, gamma, w_class, w_bbox, w_giou, precision):
    # --- focal-loss class cost, gather-first ---------------------------------
    # onehot has exact {0,1} f32 entries; at HIGHEST/HIGH precision the matmul
    # reproduces logits[:, tgt_ids[t]] (near-)exactly, so the elementwise focal
    # math commutes with the column pick and runs on (TM, Tpad) not (TM, C).
    x = jnp.dot(logits_ref[...], onehot_ref[...],
                precision=precision,
                preferred_element_type=jnp.float32)                # (TM, Tpad)

    # Fused sigmoid / log pair: 3 EUP passes (exp, approx recip, log).
    a = jnp.abs(x)
    t = jnp.exp(-a)                                  # exp(-|x|) in (0, 1]
    r = pl.reciprocal(1.0 + t, approx=True)          # 1 / (1 + exp(-|x|))
    tr = t * r
    pos_side = x >= 0.0
    prob = jnp.where(pos_side, r, tr)                # sigmoid(x)
    one_m_prob = jnp.where(pos_side, tr, r)          # 1 - sigmoid(x)
    sp = jnp.maximum(x, 0.0) + jnp.log(1.0 + t)      # softplus(x) = -log(1-p)
    m_log_1mp = sp                                   # -log(1 - prob)
    m_log_p = sp - x                                 # -log(prob)

    if gamma == 2.0:                 # avoid generic pow (exp+log on the EUP)
        pow_p = prob * prob
        pow_1mp = one_m_prob * one_m_prob
    else:
        pow_p = jnp.power(prob, gamma)
        pow_1mp = jnp.power(one_m_prob, gamma)
    cost_class = alpha * pow_1mp * m_log_p - (1.0 - alpha) * pow_p * m_log_1mp

    # --- L1 box cost (torch.cdist p=1) ----------------------------------------
    pcx = bbox_ref[:, 0:1]
    pcy = bbox_ref[:, 1:2]
    pw = bbox_ref[:, 2:3]
    ph = bbox_ref[:, 3:4]                                          # (TM, 1)
    tcx = tgt_bbox_ref[0:1, :]
    tcy = tgt_bbox_ref[1:2, :]
    tw = tgt_bbox_ref[2:3, :]
    th = tgt_bbox_ref[3:4, :]                                      # (1, Tpad)

    cost_bbox = (jnp.abs(pcx - tcx) + jnp.abs(pcy - tcy) +
                 jnp.abs(pw - tw) + jnp.abs(ph - th))              # (TM, Tpad)

    # --- generalized IoU cost --------------------------------------------------
    px0 = pcx - 0.5 * pw
    py0 = pcy - 0.5 * ph
    px1 = pcx + 0.5 * pw
    py1 = pcy + 0.5 * ph
    tx0 = tcx - 0.5 * tw
    ty0 = tcy - 0.5 * th
    tx1 = tcx + 0.5 * tw
    ty1 = tcy + 0.5 * th

    area_p = pw * ph                                               # (TM, 1)
    area_t = tw * th                                               # (1, Tpad)

    raw_iw = jnp.minimum(px1, tx1) - jnp.maximum(px0, tx0)         # (TM, Tpad)
    raw_ih = jnp.minimum(py1, ty1) - jnp.maximum(py0, ty0)
    inter = jnp.maximum(raw_iw, 0.0) * jnp.maximum(raw_ih, 0.0)
    union = area_p + area_t - inter
    iou = inter * pl.reciprocal(union, approx=True)

    # enclosing box via max+min = sum identity (no second min/max pass)
    enc_w = (pw + tw) - raw_iw
    enc_h = (ph + th) - raw_ih
    enc_area = enc_w * enc_h
    giou = iou - (enc_area - union) * pl.reciprocal(enc_area, approx=True)
    cost_giou = -giou

    out_ref[...] = (w_bbox * cost_bbox + w_class * cost_class +
                    w_giou * cost_giou).astype(out_ref.dtype)


# ----------------------------------------------------------------------------
# wrapper: pad + tile + pallas_call
# ----------------------------------------------------------------------------
def compute_cost_matrix(pred_logits, pred_boxes, tgt_ids_pad, tgt_boxes_pad_t, *,
                        cost_class=1.0, cost_bbox=1.0, cost_giou=1.0,
                        alpha=0.25, gamma=2.0, query_tile=1024):
    """Per-batch block-diagonal cost matrices, shape (bs, nq_pad, t_pad) f32.

    tgt_ids_pad:     (bs, 1, t_pad)  int32, padded with a valid dummy class (0).
    tgt_boxes_pad_t: (bs, 4, t_pad)  f32 cxcywh (coords on rows), padded with
                     valid dummy boxes.
    Only [:, :num_queries, :num_targets_b] of batch b is meaningful.
    """
    bs, nq, nc = pred_logits.shape
    t_pad = int(tgt_ids_pad.shape[-1])
    nc = int(nc)
    c_pad = nc if nc % 128 == 0 else _round_up(max(nc, 128), 128)
    nq_pad, tm = _choose_query_tile(nq, query_tile)

    logits = pred_logits if pred_logits.dtype == jnp.float32 \
        else pred_logits.astype(jnp.float32)
    boxes = pred_boxes if pred_boxes.dtype == jnp.float32 \
        else pred_boxes.astype(jnp.float32)
    if nq_pad != nq or c_pad != nc:
        logits = jnp.pad(logits, ((0, 0), (0, nq_pad - nq), (0, c_pad - nc)))
    if nq_pad != nq:
        # zero pred boxes are safe: every target column (real or dummy) has a
        # valid box, so union/enc_area stay strictly positive for padded rows.
        boxes = jnp.pad(boxes, ((0, 0), (0, nq_pad - nq), (0, 0)))

    # Onehot gather matrix built once (outside the kernel's query-tile loop);
    # it is VMEM-resident across the query-tile grid axis via index_map (b,0,0).
    class_iota = jnp.arange(c_pad, dtype=jnp.int32)[None, :, None]  # (1,Cpad,1)
    onehot = (class_iota == tgt_ids_pad.astype(jnp.int32)
              ).astype(jnp.float32)                                 # (bs,Cpad,Tpad)

    precision = (jax.lax.Precision.HIGHEST if c_pad < 1024
                 else jax.lax.Precision.HIGH)
    kernel = functools.partial(
        _cost_kernel,
        alpha=float(alpha), gamma=float(gamma),
        w_class=float(cost_class), w_bbox=float(cost_bbox),
        w_giou=float(cost_giou), precision=precision)

    grid = (bs, nq_pad // tm)
    grid_spec = pltpu.PrefetchScalarGridSpec(
        num_scalar_prefetch=0,
        grid=grid,
        in_specs=[
            pl.BlockSpec((None, tm, c_pad), lambda b, i: (b, i, 0)),
            pl.BlockSpec((None, tm, 4), lambda b, i: (b, i, 0)),
            pl.BlockSpec((None, c_pad, t_pad), lambda b, i: (b, 0, 0)),
            pl.BlockSpec((None, 4, t_pad), lambda b, i: (b, 0, 0)),
        ],
        out_specs=pl.BlockSpec((None, tm, t_pad), lambda b, i: (b, i, 0)),
    )

    return pl.pallas_call(
        kernel,
        out_shape=jax.ShapeDtypeStruct((bs, nq_pad, t_pad), jnp.float32),
        grid_spec=grid_spec,
        compiler_params=pltpu.CompilerParams(
            dimension_semantics=("parallel", "parallel")),
    )(logits, boxes, onehot, tgt_boxes_pad_t.astype(jnp.float32))


def _pad_targets(targets, t_bucket=128):
    """Pack per-batch targets into lane-dense (bs,1,Tpad) ids / (bs,4,Tpad)
    transposed boxes, padded to a multiple-of-128 bucket (no recompiles, no
    masked partial stores).  Padding uses a valid dummy class/box; the host only
    reads the first sizes[b] columns of batch b."""
    bs = len(targets)
    sizes = [int(np.asarray(t["boxes"]).shape[0]) for t in targets]
    t_max = max(sizes) if sizes else 0
    t_pad = _round_up(max(t_max, 1), t_bucket)

    ids = np.zeros((bs, 1, t_pad), dtype=np.int32)
    boxes = np.zeros((bs, 4, t_pad), dtype=np.float32)
    boxes[:, 0:2, :] = 0.5          # valid dummy box: cx=cy=0.5, w=h=1.0
    boxes[:, 2:4, :] = 1.0
    for b, t in enumerate(targets):
        s = sizes[b]
        if s == 0:
            continue
        ids[b, 0, :s] = np.asarray(t["labels"], dtype=np.int32)
        boxes[b, :, :s] = np.asarray(t["boxes"], dtype=np.float32).T
    return jnp.asarray(ids), jnp.asarray(boxes), sizes, t_pad


# ----------------------------------------------------------------------------
# Host-side exact Hungarian assignment
# TODO(synk): linear_sum_assignment is inherently sequential / data-dependent;
#             it runs on the host (scipy if available, else exact Kuhn-Munkres).
# ----------------------------------------------------------------------------
def _km_assignment(cost):
    cost = np.asarray(cost, dtype=np.float64)
    transposed = False
    if cost.shape[0] > cost.shape[1]:
        cost = cost.T
        transposed = True
    n, m = cost.shape  # n <= m
    u = np.zeros(n + 1)
    v = np.zeros(m + 1)
    p = np.zeros(m + 1, dtype=np.int64)
    way = np.zeros(m + 1, dtype=np.int64)
    INF = float("inf")
    for i in range(1, n + 1):
        p[0] = i
        j0 = 0
        minv = np.full(m + 1, INF)
        used = np.zeros(m + 1, dtype=bool)
        while True:
            used[j0] = True
            i0 = p[j0]
            delta = INF
            j1 = -1
            for j in range(1, m + 1):
                if not used[j]:
                    cur = cost[i0 - 1, j - 1] - u[i0] - v[j]
                    if cur < minv[j]:
                        minv[j] = cur
                        way[j] = j0
                    if minv[j] < delta:
                        delta = minv[j]
                        j1 = j
            for j in range(m + 1):
                if used[j]:
                    u[p[j]] += delta
                    v[j] -= delta
                else:
                    minv[j] -= delta
            j0 = j1
            if p[j0] == 0:
                break
        while True:
            j1 = way[j0]
            p[j0] = p[j1]
            j0 = j1
            if j0 == 0:
                break
    rows, cols = [], []
    for j in range(1, m + 1):
        if p[j] != 0:
            rows.append(p[j] - 1)
            cols.append(j - 1)
    row_arr = np.array(rows, dtype=np.int64)
    col_arr = np.array(cols, dtype=np.int64)
    if transposed:
        row_arr, col_arr = col_arr, row_arr
    order = np.argsort(row_arr, kind="stable")
    return row_arr[order], col_arr[order]


def _linear_sum_assignment(cost):
    if _scipy_lsa is not None:
        r, c = _scipy_lsa(np.asarray(cost, dtype=np.float64))
        return np.asarray(r, dtype=np.int64), np.asarray(c, dtype=np.int64)
    return _km_assignment(cost)


# ----------------------------------------------------------------------------
# HungarianMatcher forward (focal_loss_cost variant)
# ----------------------------------------------------------------------------
def hungarian_matcher(outputs, targets, *, cost_class=1.0, cost_bbox=1.0,
                      cost_giou=1.0, alpha=0.25, gamma=2.0):
    pred_logits = outputs["pred_logits"]
    pred_boxes = outputs["pred_boxes"]
    bs, nq = pred_logits.shape[:2]

    tgt_ids_pad, tgt_boxes_pad_t, sizes, _ = _pad_targets(targets)
    C = compute_cost_matrix(pred_logits, pred_boxes, tgt_ids_pad,
                            tgt_boxes_pad_t,
                            cost_class=cost_class, cost_bbox=cost_bbox,
                            cost_giou=cost_giou, alpha=alpha, gamma=gamma)
    # Trim the padded rows/columns on device before the D2H transfer.
    t_view = max(max(sizes) if sizes else 0, 1)
    C_trim = jax.block_until_ready(C[:, :nq, :t_view])
    C_np = np.asarray(C_trim)                  # (bs, nq, t_view)

    indices = []
    for b, s in enumerate(sizes):
        if s == 0:
            indices.append((np.zeros(0, np.int64), np.zeros(0, np.int64)))
            continue
        indices.append(_linear_sum_assignment(C_np[b, :, :s]))
    return [(np.asarray(i, dtype=np.int64), np.asarray(j, dtype=np.int64))
            for i, j in indices]


# ----------------------------------------------------------------------------
# numpy reference (for correctness check in __main__)
# ----------------------------------------------------------------------------
def _reference_cost(logits, boxes, tgt_ids, tgt_boxes, *, cost_class, cost_bbox,
                    cost_giou, alpha, gamma):
    logits = np.asarray(logits, np.float64)
    boxes = np.asarray(boxes, np.float64)
    tgt_ids = np.asarray(tgt_ids)
    tgt_boxes = np.asarray(tgt_boxes, np.float64)

    prob = 1.0 / (1.0 + np.exp(-logits))
    neg = (1 - alpha) * prob ** gamma * -np.log(1 - prob + 1e-8)
    pos = alpha * (1 - prob) ** gamma * -np.log(prob + 1e-8)
    cc = pos[:, tgt_ids] - neg[:, tgt_ids]
    cb = np.abs(boxes[:, None, :] - tgt_boxes[None, :, :]).sum(-1)

    def to_xyxy(b):
        cx, cy, w, h = b[..., 0], b[..., 1], b[..., 2], b[..., 3]
        return np.stack([cx - 0.5 * w, cy - 0.5 * h,
                         cx + 0.5 * w, cy + 0.5 * h], -1)

    pb, tb = to_xyxy(boxes), to_xyxy(tgt_boxes)
    area_p = (pb[:, 2] - pb[:, 0]) * (pb[:, 3] - pb[:, 1])
    area_t = (tb[:, 2] - tb[:, 0]) * (tb[:, 3] - tb[:, 1])
    lt = np.maximum(pb[:, None, :2], tb[None, :, :2])
    rb = np.minimum(pb[:, None, 2:], tb[None, :, 2:])
    wh = np.clip(rb - lt, 0.0, None)
    inter = wh[..., 0] * wh[..., 1]
    union = area_p[:, None] + area_t[None, :] - inter
    iou = inter / union
    lt2 = np.minimum(pb[:, None, :2], tb[None, :, :2])
    rb2 = np.maximum(pb[:, None, 2:], tb[None, :, 2:])
    wh2 = np.clip(rb2 - lt2, 0.0, None)
    enc = wh2[..., 0] * wh2[..., 1]
    giou = iou - (enc - union) / enc
    return cost_bbox * cb + cost_class * cc + cost_giou * (-giou)


if __name__ == "__main__":
    key = jax.random.PRNGKey(0)
    bs, num_queries, num_classes = 2, 8, 16
    k1, k2, k3, k4, k5, k6 = jax.random.split(key, 6)

    pred_logits = jax.random.normal(k1, (bs, num_queries, num_classes), jnp.float32)
    p_cxcy = jax.random.uniform(k2, (bs, num_queries, 2), minval=0.2, maxval=0.8)
    p_wh = jax.random.uniform(k3, (bs, num_queries, 2), minval=0.05, maxval=0.3)
    pred_boxes = jnp.concatenate([p_cxcy, p_wh], axis=-1).astype(jnp.float32)

    # targets: batch 0 has 3 GT boxes, batch 1 has 4 GT boxes
    sizes = [3, 4]
    labels_all = jax.random.randint(k4, (sum(sizes),), 0, num_classes, jnp.int32)
    t_cxcy = jax.random.uniform(k5, (sum(sizes), 2), minval=0.2, maxval=0.8)
    t_wh = jax.random.uniform(k6, (sum(sizes), 2), minval=0.05, maxval=0.3)
    boxes_all = jnp.concatenate([t_cxcy, t_wh], axis=-1).astype(jnp.float32)

    targets = []
    off = 0
    for s in sizes:
        targets.append({"labels": labels_all[off:off + s],
                        "boxes": boxes_all[off:off + s]})
        off += s

    outputs = {"pred_logits": pred_logits, "pred_boxes": pred_boxes}
    indices = hungarian_matcher(outputs, targets,
                                cost_class=1.0, cost_bbox=1.0, cost_giou=1.0,
                                alpha=0.25, gamma=2.0)

    # structural sanity: one match per GT box, distinct query indices
    for (i_idx, j_idx), s in zip(indices, sizes):
        assert len(i_idx) == len(j_idx) == min(num_queries, s)
        assert len(set(i_idx.tolist())) == len(i_idx)

    # numerical sanity: kernel cost blocks vs. numpy reference
    tgt_ids_pad, tgt_boxes_pad_t, sizes_chk, _ = _pad_targets(targets)
    C = jax.block_until_ready(compute_cost_matrix(
        pred_logits, pred_boxes, tgt_ids_pad, tgt_boxes_pad_t,
        cost_class=1.0, cost_bbox=1.0, cost_giou=1.0, alpha=0.25, gamma=2.0))
    C_np = np.asarray(C)
    for b, s in enumerate(sizes_chk):
        ref = _reference_cost(np.asarray(pred_logits[b]),
                              np.asarray(pred_boxes[b]),
                              np.asarray(targets[b]["labels"]),
                              np.asarray(targets[b]["boxes"]),
                              cost_class=1.0, cost_bbox=1.0, cost_giou=1.0,
                              alpha=0.25, gamma=2.0)
        got = C_np[b, :num_queries, :s]
        assert np.all(np.isfinite(got))
        assert np.allclose(got, ref, rtol=5e-2, atol=5e-2), \
            float(np.abs(got - ref).max())

    print("KERNEL_OK")
</pallas_src>

<mosaic_0001>
module attributes {stable_mosaic.version = 11 : i64} {
  func.func @_cost_kernel(%arg0: i32, %arg1: i32, %arg2: memref<1x8x128xf32, #tpu.memory_space<vmem>>, %arg3: memref<1x8x4xf32, #tpu.memory_space<vmem>>, %arg4: memref<1x128x128xf32, #tpu.memory_space<vmem>>, %arg5: memref<1x4x128xf32, #tpu.memory_space<vmem>>, %arg6: memref<1x8x128xf32, #tpu.memory_space<vmem>>) attributes {dimension_semantics = [#tpu.dimension_semantics<parallel>, #tpu.dimension_semantics<parallel>], iteration_bounds = array<i64: 2, 1>, scalar_prefetch = 0 : i64, scratch_operands = 0 : i64, tpu.core_type = #tpu.core_type<tc>, window_params = [{transform_indices = @transform_0, window_bounds = array<i64: 1, 8, 128>}, {transform_indices = @transform_1, window_bounds = array<i64: 1, 8, 4>}, {transform_indices = @transform_2, window_bounds = array<i64: 1, 128, 128>}, {transform_indices = @transform_3, window_bounds = array<i64: 1, 4, 128>}, {transform_indices = @transform_4, window_bounds = array<i64: 1, 8, 128>}]} {
    %c0 = arith.constant 0 : index
    %c0_0 = arith.constant 0 : index
    %c0_1 = arith.constant 0 : index
    %0 = vector.load %arg2[%c0, %c0_0, %c0_1] : memref<1x8x128xf32, #tpu.memory_space<vmem>>, vector<1x8x128xf32>
    %1 = vector.shape_cast %0 : vector<1x8x128xf32> to vector<8x128xf32>
    %c0_2 = arith.constant 0 : index
    %c0_3 = arith.constant 0 : index
    %c0_4 = arith.constant 0 : index
    %2 = vector.load %arg4[%c0_2, %c0_3, %c0_4] : memref<1x128x128xf32, #tpu.memory_space<vmem>>, vector<1x128x128xf32>
    %3 = vector.shape_cast %2 : vector<1x128x128xf32> to vector<128x128xf32>
    %cst = arith.constant dense<0.000000e+00> : vector<8x128xf32>
    %4 = tpu.matmul %1, %3, %cst {dimension_numbers = #tpu.dot_dimension_numbers<[1], [0], [0], [1], [0, 0, 1, 1], [], []>, precision = #tpu.contract_precision<fp32>} : vector<8x128xf32>, vector<128x128xf32>, vector<8x128xf32> -> vector<8x128xf32>
    %5 = math.absf %4 : vector<8x128xf32>
    %cst_5 = arith.constant 0.000000e+00 : f32
    %6 = vector.broadcast %cst_5 : f32 to vector<8x128xf32>
    %7 = arith.subf %6, %5 : vector<8x128xf32>
    %8 = math.exp %7 : vector<8x128xf32>
    %cst_6 = arith.constant 1.000000e+00 : f32
    %9 = vector.broadcast %cst_6 : f32 to vector<8x128xf32>
    %10 = arith.addf %9, %8 : vector<8x128xf32>
    %11 = tpu.reciprocal %10 {approx = true} : vector<8x128xf32> -> vector<8x128xf32>
    %12 = arith.mulf %8, %11 : vector<8x128xf32>
    %cst_7 = arith.constant 0.000000e+00 : f32
    %13 = vector.broadcast %cst_7 : f32 to vector<8x128xf32>
    %14 = arith.cmpf oge, %4, %13 : vector<8x128xf32>
    %15 = arith.select %14, %11, %12 : vector<8x128xi1>, vector<8x128xf32>
    %16 = arith.select %14, %12, %11 : vector<8x128xi1>, vector<8x128xf32>
    %cst_8 = arith.constant 0.000000e+00 : f32
    %17 = vector.broadcast %cst_8 : f32 to vector<8x128xf32>
    %18 = arith.maximumf %4, %17 : vector<8x128xf32>
    %cst_9 = arith.constant 1.000000e+00 : f32
    %19 = vector.broadcast %cst_9 : f32 to vector<8x128xf32>
    %20 = arith.addf %19, %8 : vector<8x128xf32>
    %21 = math.log %20 : vector<8x128xf32>
    %22 = arith.addf %18, %21 : vector<8x128xf32>
    %23 = arith.subf %22, %4 : vector<8x128xf32>
    %24 = arith.mulf %15, %15 : vector<8x128xf32>
    %25 = arith.mulf %16, %16 : vector<8x128xf32>
    %cst_10 = arith.constant 2.500000e-01 : f32
    %26 = vector.broadcast %cst_10 : f32 to vector<8x128xf32>
    %27 = arith.mulf %26, %25 : vector<8x128xf32>
    %28 = arith.mulf %27, %23 : vector<8x128xf32>
    %cst_11 = arith.constant 7.500000e-01 : f32
    %29 = vector.broadcast %cst_11 : f32 to vector<8x128xf32>
    %30 = arith.mulf %29, %24 : vector<8x128xf32>
    %31 = arith.mulf %30, %22 : vector<8x128xf32>
    %32 = arith.subf %28, %31 : vector<8x128xf32>
    %c0_12 = arith.constant 0 : index
    %c0_13 = arith.constant 0 : index
    %c0_14 = arith.constant 0 : index
    %33 = vector.load %arg3[%c0_12, %c0_13, %c0_14] : memref<1x8x4xf32, #tpu.memory_space<vmem>>, vector<1x8x1xf32>
    %34 = vector.shape_cast %33 : vector<1x8x1xf32> to vector<8x1xf32>
    %c0_15 = arith.constant 0 : index
    %c0_16 = arith.constant 0 : index
    %c1 = arith.constant 1 : index
    %35 = vector.load %arg3[%c0_15, %c0_16, %c1] : memref<1x8x4xf32, #tpu.memory_space<vmem>>, vector<1x8x1xf32>
    %36 = vector.shape_cast %35 : vector<1x8x1xf32> to vector<8x1xf32>
    %c0_17 = arith.constant 0 : index
    %c0_18 = arith.constant 0 : index
    %c2 = arith.constant 2 : index
    %37 = vector.load %arg3[%c0_17, %c0_18, %c2] : memref<1x8x4xf32, #tpu.memory_space<vmem>>, vector<1x8x1xf32>
    %38 = vector.shape_cast %37 : vector<1x8x1xf32> to vector<8x1xf32>
    %c0_19 = arith.constant 0 : index
    %c0_20 = arith.constant 0 : index
    %c3 = arith.constant 3 : index
    %39 = vector.load %arg3[%c0_19, %c0_20, %c3] : memref<1x8x4xf32, #tpu.memory_space<vmem>>, vector<1x8x1xf32>
    %40 = vector.shape_cast %39 : vector<1x8x1xf32> to vector<8x1xf32>
    %c0_21 = arith.constant 0 : index
    %c0_22 = arith.constant 0 : index
    %c0_23 = arith.constant 0 : index
    %41 = vector.load %arg5[%c0_21, %c0_22, %c0_23] : memref<1x4x128xf32, #tpu.memory_space<vmem>>, vector<1x1x128xf32>
    %42 = vector.shape_cast %41 : vector<1x1x128xf32> to vector<1x128xf32>
    %c0_24 = arith.constant 0 : index
    %c1_25 = arith.constant 1 : index
    %c0_26 = arith.constant 0 : index
    %43 = vector.load %arg5[%c0_24, %c1_25, %c0_26] : memref<1x4x128xf32, #tpu.memory_space<vmem>>, vector<1x1x128xf32>
    %44 = vector.shape_cast %43 : vector<1x1x128xf32> to vector<1x128xf32>
    %c0_27 = arith.constant 0 : index
    %c2_28 = arith.constant 2 : index
    %c0_29 = arith.constant 0 : index
    %45 = vector.load %arg5[%c0_27, %c2_28, %c0_29] : memref<1x4x128xf32, #tpu.memory_space<vmem>>, vector<1x1x128xf32>
    %46 = vector.shape_cast %45 : vector<1x1x128xf32> to vector<1x128xf32>
    %c0_30 = arith.constant 0 : index
    %c3_31 = arith.constant 3 : index
    %c0_32 = arith.constant 0 : index
    %47 = vector.load %arg5[%c0_30, %c3_31, %c0_32] : memref<1x4x128xf32, #tpu.memory_space<vmem>>, vector<1x1x128xf32>
    %48 = vector.shape_cast %47 : vector<1x1x128xf32> to vector<1x128xf32>
    %49 = vector.broadcast %34 : vector<8x1xf32> to vector<8x128xf32>
    %50 = vector.broadcast %42 : vector<1x128xf32> to vector<8x128xf32>
    %51 = arith.subf %49, %50 : vector<8x128xf32>
    %52 = math.absf %51 : vector<8x128xf32>
    %53 = vector.broadcast %36 : vector<8x1xf32> to vector<8x128xf32>
    %54 = vector.broadcast %44 : vector<1x128xf32> to vector<8x128xf32>
    %55 = arith.subf %53, %54 : vector<8x128xf32>
    %56 = math.absf %55 : vector<8x128xf32>
    %57 = arith.addf %52, %56 : vector<8x128xf32>
    %58 = vector.broadcast %38 : vector<8x1xf32> to vector<8x128xf32>
    %59 = vector.broadcast %46 : vector<1x128xf32> to vector<8x128xf32>
    %60 = arith.subf %58, %59 : vector<8x128xf32>
    %61 = math.absf %60 : vector<8x128xf32>
    %62 = arith.addf %57, %61 : vector<8x128xf32>
    %63 = vector.broadcast %40 : vector<8x1xf32> to vector<8x128xf32>
    %64 = vector.broadcast %48 : vector<1x128xf32> to vector<8x128xf32>
    %65 = arith.subf %63, %64 : vector<8x128xf32>
    %66 = math.absf %65 : vector<8x128xf32>
    %67 = arith.addf %62, %66 : vector<8x128xf32>
    %cst_33 = arith.constant 5.000000e-01 : f32
    %68 = vector.broadcast %cst_33 : f32 to vector<8x1xf32>
    %69 = arith.mulf %68, %38 : vector<8x1xf32>
    %70 = arith.subf %34, %69 : vector<8x1xf32>
    %cst_34 = arith.constant 5.000000e-01 : f32
    %71 = vector.broadcast %cst_34 : f32 to vector<8x1xf32>
    %72 = arith.mulf %71, %40 : vector<8x1xf32>
    %73 = arith.subf %36, %72 : vector<8x1xf32>
    %cst_35 = arith.constant 5.000000e-01 : f32
    %74 = vector.broadcast %cst_35 : f32 to vector<8x1xf32>
    %75 = arith.mulf %74, %38 : vector<8x1xf32>
    %76 = arith.addf %34, %75 : vector<8x1xf32>
    %cst_36 = arith.constant 5.000000e-01 : f32
    %77 = vector.broadcast %cst_36 : f32 to vector<8x1xf32>
    %78 = arith.mulf %77, %40 : vector<8x1xf32>
    %79 = arith.addf %36, %78 : vector<8x1xf32>
    %cst_37 = arith.constant 5.000000e-01 : f32
    %80 = vector.broadcast %cst_37 : f32 to vector<1x128xf32>
    %81 = arith.mulf %80, %46 : vector<1x128xf32>
    %82 = arith.subf %42, %81 : vector<1x128xf32>
    %cst_38 = arith.constant 5.000000e-01 : f32
    %83 = vector.broadcast %cst_38 : f32 to vector<1x128xf32>
    %84 = arith.mulf %83, %48 : vector<1x128xf32>
    %85 = arith.subf %44, %84 : vector<1x128xf32>
    %cst_39 = arith.constant 5.000000e-01 : f32
    %86 = vector.broadcast %cst_39 : f32 to vector<1x128xf32>
    %87 = arith.mulf %86, %46 : vector<1x128xf32>
    %88 = arith.addf %42, %87 : vector<1x128xf32>
    %cst_40 = arith.constant 5.000000e-01 : f32
    %89 = vector.broadcast %cst_40 : f32 to vector<1x128xf32>
    %90 = arith.mulf %89, %48 : vector<1x128xf32>
    %91 = arith.addf %44, %90 : vector<1x128xf32>
    %92 = arith.mulf %38, %40 : vector<8x1xf32>
    %93 = arith.mulf %46, %48 : vector<1x128xf32>
    %94 = vector.broadcast %76 : vector<8x1xf32> to vector<8x128xf32>
    %95 = vector.broadcast %88 : vector<1x128xf32> to vector<8x128xf32>
    %96 = arith.minimumf %94, %95 : vector<8x128xf32>
    %97 = vector.broadcast %70 : vector<8x1xf32> to vector<8x128xf32>
    %98 = vector.broadcast %82 : vector<1x128xf32> to vector<8x128xf32>
    %99 = arith.maximumf %97, %98 : vector<8x128xf32>
    %100 = arith.subf %96, %99 : vector<8x128xf32>
    %101 = vector.broadcast %79 : vector<8x1xf32> to vector<8x128xf32>
    %102 = vector.broadcast %91 : vector<1x128xf32> to vector<8x128xf32>
    %103 = arith.minimumf %101, %102 : vector<8x128xf32>
    %104 = vector.broadcast %73 : vector<8x1xf32> to vector<8x128xf32>
    %105 = vector.broadcast %85 : vector<1x128xf32> to vector<8x128xf32>
    %106 = arith.maximumf %104, %105 : vector<8x128xf32>
    %107 = arith.subf %103, %106 : vector<8x128xf32>
    %cst_41 = arith.constant 0.000000e+00 : f32
    %108 = vector.broadcast %cst_41 : f32 to vector<8x128xf32>
    %109 = arith.maximumf %100, %108 : vector<8x128xf32>
    %cst_42 = arith.constant 0.000000e+00 : f32
    %110 = vector.broadcast %cst_42 : f32 to vector<8x128xf32>
    %111 = arith.maximumf %107, %110 : vector<8x128xf32>
    %112 = arith.mulf %109, %111 : vector<8x128xf32>
    %113 = vector.broadcast %92 : vector<8x1xf32> to vector<8x128xf32>
    %114 = vector.broadcast %93 : vector<1x128xf32> to vector<8x128xf32>
    %115 = arith.addf %113, %114 : vector<8x128xf32>
    %116 = arith.subf %115, %112 : vector<8x128xf32>
    %117 = tpu.reciprocal %116 {approx = true} : vector<8x128xf32> -> vector<8x128xf32>
    %118 = arith.mulf %112, %117 : vector<8x128xf32>
    %119 = vector.broadcast %38 : vector<8x1xf32> to vector<8x128xf32>
    %120 = vector.broadcast %46 : vector<1x128xf32> to vector<8x128xf32>
    %121 = arith.addf %119, %120 : vector<8x128xf32>
    %122 = arith.subf %121, %100 : vector<8x128xf32>
    %123 = vector.broadcast %40 : vector<8x1xf32> to vector<8x128xf32>
    %124 = vector.broadcast %48 : vector<1x128xf32> to vector<8x128xf32>
    %125 = arith.addf %123, %124 : vector<8x128xf32>
    %126 = arith.subf %125, %107 : vector<8x128xf32>
    %127 = arith.mulf %122, %126 : vector<8x128xf32>
    %128 = arith.subf %127, %116 : vector<8x128xf32>
    %129 = tpu.reciprocal %127 {approx = true} : vector<8x128xf32> -> vector<8x128xf32>
    %130 = arith.mulf %128, %129 : vector<8x128xf32>
    %131 = arith.subf %118, %130 : vector<8x128xf32>
    %cst_43 = arith.constant 0.000000e+00 : f32
    %132 = vector.broadcast %cst_43 : f32 to vector<8x128xf32>
    %133 = arith.subf %132, %131 : vector<8x128xf32>
    %cst_44 = arith.constant 1.000000e+00 : f32
    %134 = vector.broadcast %cst_44 : f32 to vector<8x128xf32>
    %135 = arith.mulf %134, %67 : vector<8x128xf32>
    %cst_45 = arith.constant 1.000000e+00 : f32
    %136 = vector.broadcast %cst_45 : f32 to vector<8x128xf32>
    %137 = arith.mulf %136, %32 : vector<8x128xf32>
    %138 = arith.addf %135, %137 : vector<8x128xf32>
    %cst_46 = arith.constant 1.000000e+00 : f32
    %139 = vector.broadcast %cst_46 : f32 to vector<8x128xf32>
    %140 = arith.mulf %139, %133 : vector<8x128xf32>
    %141 = arith.addf %138, %140 : vector<8x128xf32>
    %c0_47 = arith.constant 0 : index
    %c0_48 = arith.constant 0 : index
    %c0_49 = arith.constant 0 : index
    %142 = vector.load %arg6[%c0_47, %c0_48, %c0_49] : memref<1x8x128xf32, #tpu.memory_space<vmem>>, vector<1x8x128xf32>
    %143 = vector.shape_cast %142 : vector<1x8x128xf32> to vector<8x128xf32>
    %144 = vector.shape_cast %141 : vector<8x128xf32> to vector<1x8x128xf32>
    tpu.vector_store %arg6[%c0_47, %c0_48, %c0_49], %144 {strides = array<i32>} : memref<1x8x128xf32, #tpu.memory_space<vmem>>, vector<1x8x128xf32>,
    return
  }
  func.func @transform_0(%arg0: i32, %arg1: i32) -> (i32, i32, i32) {
    %c0_i32 = arith.constant 0 : i32
    %c0_i32_0 = arith.constant 0 : i32
    return %arg0, %arg1, %c0_i32 : i32, i32, i32
  }
  func.func @transform_1(%arg0: i32, %arg1: i32) -> (i32, i32, i32) {
    %c0_i32 = arith.constant 0 : i32
    %c0_i32_0 = arith.constant 0 : i32
    return %arg0, %arg1, %c0_i32 : i32, i32, i32
  }
  func.func @transform_2(%arg0: i32, %arg1: i32) -> (i32, i32, i32) {
    %c0_i32 = arith.constant 0 : i32
    %c0_i32_0 = arith.constant 0 : i32
    %c0_i32_1 = arith.constant 0 : i32
    return %arg0, %c0_i32, %c0_i32_0 : i32, i32, i32
  }
  func.func @transform_3(%arg0: i32, %arg1: i32) -> (i32, i32, i32) {
    %c0_i32 = arith.constant 0 : i32
    %c0_i32_0 = arith.constant 0 : i32
    %c0_i32_1 = arith.constant 0 : i32
    return %arg0, %c0_i32, %c0_i32_0 : i32, i32, i32
  }
  func.func @transform_4(%arg0: i32, %arg1: i32) -> (i32, i32, i32) {
    %c0_i32 = arith.constant 0 : i32
    %c0_i32_0 = arith.constant 0 : i32
    return %arg0, %arg1, %c0_i32 : i32, i32, i32
  }
}

</mosaic_0001>

<bundles_post_ra>
// kernel: tpu_custom_call.1
= control target key start
LH: loop header
LB: loop body
LE: loop exit
PB: predicated region body
PF: predicated region fallthrough
CT: control target
= control target key end

     0   :  { %9 = vsyncpa [#allocation3], 0  ;;  %s1615_s0 = inlined_call_operand.vmem [shape: f32[2,8,128], index: 0, kind: input, shape index: {}]   ;;  %s1616_s1 = inlined_call_operand.vmem [shape: f32[2,8,4], index: 1, kind: input, shape index: {}]   ;;  %s1617_s2 = inlined_call_operand.hbm [shape: f32[2,128,128], index: 2, kind: input, shape index: {}]   ;;  %s1618_s3 = inlined_call_operand.vmem [shape: f32[2,4,128], index: 3, kind: input, shape index: {}]   ;;  %s1619_s4 = inlined_call_operand.hbm [shape: f32[2,8,128], index: 4, kind: output, shape index: {}]  }
   0x1   :  { %11 = vsyncpa [#allocation3 + $0x1], 0 }
   0x2   :  { %12 = vsyncpa [#allocation4], 0 }
   0x3   :  { %14 = vsyncpa [#allocation4 + $0x1], 0  ;;  %s1188_s15 = smov 0   ;;  %s1190_s16 = smov 0  }
   0x4   :  { %s1192_s17 = smov 0   ;;  %s1194_s18 = smov 0  }
   0x5   :  { %s1196_s19 = smov 0   ;;  %s1198_s20 = smov 0  }
   0x6 LB: > { %s932_s21 = sadd.s32 4294967295, %s1153_s20   ;;  %s933_s22 = sadd.s32 4294967294, %s1153_s20   ;;  %s1153_s20 = sphi %s1198_s20, %s20_s20   ;;  %s1149_s19 = sphi %s1196_s19, %s1628_s19   ;;  %s1145_s18 = sphi %s1194_s18, %s1627_s18   ;;  %s1141_s17 = sphi %s1192_s17, %s1626_s17   ;;  %s1137_s16 = sphi %s1190_s16, %s1625_s16   ;;  %s1133_s15 = sphi %s1188_s15, %s1624_s15  }
   0x7   : > { %s32_s23 = sadd.s32 1, %s1149_s19  ;;  %s95_s24 = sadd.s32 1, %s1141_s17 }
   0x8   : > { %p34_p0 = scmp.ge.s32.totalorder %s32_s23, 2  ;;  %p102_p1 = scmp.ne.s32.totalorder %s1141_s17, %s1137_s16 }
   0x9   : > { %p103_p2 = scmp.eq.s32.totalorder %s1153_s20, 0  ;;  %p108_p3 = scmp.ne.s32.totalorder %s1137_s16, %s1133_s15 }
   0xa   : > { %s1630_s23 = smov (%p34_p0, %s32_s23), 0  ;;  %p109_p5 = scmp.eq.s32.totalorder %s932_s21, 0 }
   0xb   : > { %p1229_p4 = por %p103_p2, %p102_p1  ;;  %s92_s26 = ssub.s32 %s1149_s19, %s1630_s23 }
   0xc   : > { %p160_p6 = scmp.eq.s32.totalorder %s932_s21, 1  ;;  %p93_p7 = scmp.eq.s32.totalorder %s92_s26, 0 }
   0xd   : > { %p1235_p8 = por %p109_p5, %p108_p3  ;;  %p166_p10 = scmp.eq.s32.totalorder %s933_s22, 1 }
   0xe   : > { %p1239_p9 = por %p160_p6, %p102_p1  ;;  %p935_p12 = scmp.ge.s32.totalorder %s1153_s20, 2 }
   0xf   : > { %s1244_s29 = scalar_select %p93_p7, %s1141_s17, %s95_s24  }
  0x10   : > { %p1246_p11 = por %p166_p10, %p108_p3  ;;  %p962_p13 = scmp.lt.s32.totalorder %s1153_s20, 2 }
  0x11   : > { %s206_s5 = sand.u32 1, %s1141_s17   ;;  %s949_s7 = sshll.u32 %s1149_s19, 7 }
  0x12   : > { %s936_s6 = sshll.u32 %s206_s5, 7  ;;  %s215_s10 = scalar_lea.hbm %s1617_s2, %s949_s7 }
  0x13   : > { %s210_s11 = scalar_lea.vmem [#allocation2], %s936_s6  ;;  %s216_s13 = sshll.u32 %s215_s10, 4  ;;  %s217_s13 = int_to_ptr.hbm [resolvable:$true] %s216_s13 }
  0x14   : > { %s218_s12 = sshll.u32 %s210_s11, 4  ;;  %p955_p0 = pnand %p962_p13, %p1229_p4  ;;  %s219_s12 = int_to_ptr.vmem [resolvable:$true] %s218_s12 }
  0x15   : > { %p939_p1 = scmp.ge.s32.totalorder %s1153_s20, 1  ;;  %s207_s14 = scalar_lea.sflag [#allocation3], %s206_s5 }
  0x16   : > { %s1155_s21 = smov 128   ;;  %s1156_s22 = smov 8  }
  0x17   : > { %957 = dma.hbm_to_vmem [thread:$0]  (!%p955_p0), %s217_s13, 2048, %s219_s12, %s207_s14, %s1155_s21, %s1155_s21, %s1156_s22  }
  0x18   : > { %p233_p2 = scmp.lt.s32.totalorder %s1153_s20, 3 }
  0x1a   : > { %p234_p3 = pnand %p939_p1, %p233_p2 }
  0x1b   : > { %s1262_s24 = sand.u32 (!%p234_p3), 1, %s1137_s16  }
  0x1c   : > { %237 = sbr.rel (%p234_p3) target bundleno = 318 (0x13e), region = 36  ;;  %s940_s26 = sshll.u32 (!%p234_p3), %s1262_s24, 7 }
  0x1d   : > { %s240_s6 = scalar_lea.sflag (!%p234_p3), [#allocation3], %s1262_s24  ;;  %s1266_s7 = scalar_lea.vmem (!%p234_p3), [#allocation2], %s940_s26 }
  0x21   : > { %1124 = dma.done.wait (%p1235_p8), %s240_s6, 2048  }
  0x22   : > { %1126 = vsyncadd (%p1235_p8), %s240_s6, 4294965248  ;;  %p287_p4 = scmp.lt.s32.totalorder %s1145_s18, 1  ;;  %v321_v1 = vld [vmem:[%s1266_s7 + $0x78] sm:$0xff]  ;;  %v320_v2 = vld [vmem:[%s1266_s7 + $0x70] sm:$0xff]  ;;  %s1157_s10 = smov 126  }
  0x23   : > { %v1287_v4 = vand.u32 4294901760, %v321_v1  ;;  %v1289_v5 = vand.u32 4294901760, %v320_v2  ;;  %v319_v6 = vld [vmem:[%s1266_s7 + $0x68] sm:$0xff]  ;;  %v318_v7 = vld [vmem:[%s1266_s7 + $0x60] sm:$0xff]  ;;  %v317_v8 = vld [vmem:[%s1266_s7 + $0x58] sm:$0xff]  ;;  %s1158_s11 = smov 127  }
  0x24   : > { %s1274_s25 = scalar_select %p287_p4, %s1145_s18, 1  ;;  %v1294_v9 = vand.u32 4294901760, %v319_v6  ;;  %v1296_v10 = vand.u32 4294901760, %v318_v7  ;;  %v1298_v11 = vand.u32 4294901760, %v317_v8  ;;  %v316_v12 = vld [vmem:[%s1266_s7 + $0x50] sm:$0xff]  ;;  %v315_v13 = vld [vmem:[%s1266_s7 + $0x48] sm:$0xff] }
  0x25   : > { %v314_v14 = vld [vmem:[%s1266_s7 + $0x40] sm:$0xff]  ;;  %323 = vmatpush.msra.mxu0 %v1287_v4  ;;  %v1305_v15 = vsub.f32 %v321_v1, %v1287_v4  ;;  %v1308_v16 = vsub.f32 %v320_v2, %v1289_v5  ;;  %v1310_v17 = vand.u32 4294901760, %v316_v12  ;;  %v1312_v18 = vand.u32 4294901760, %v315_v13  ;;  %v313_v23 = vld [vmem:[%s1266_s7 + $0x38] sm:$0xff]  ;;  %519 = vmatpush.msra.mxu3 %v1287_v4  ;;  %v312_v36 = vld [vmem:[%s1266_s7 + $0x30] sm:$0xff]  ;;  %s1091_s22 = scalar_lea.hbm %s1619_s4, 16 }
  0x26   : > { %s942_s5 = sshll.u32 %s1274_s25, 3  ;;  %v1315_v19 = vsub.f32 %v319_v6, %v1294_v9  ;;  %v1318_v20 = vsub.f32 %v318_v7, %v1296_v10  ;;  %v1321_v21 = vsub.f32 %v317_v8, %v1298_v11  ;;  %v1323_v22 = vand.u32 4294901760, %v314_v14  ;;  %v311_v41 = vld [vmem:[%s1266_s7 + $0x28] sm:$0xff]  ;;  %v310_v43 = vld [vmem:[%s1266_s7 + $0x20] sm:$0xff]  ;;  %v309_v50 = vld [vmem:[%s1266_s7 + $0x18] sm:$0xff]  ;;  %s944_s21 = sshll.u32 %s1274_s25, 2 }
  0x27   : > { %s300_s27 = scalar_lea.vmem %s1616_s1, %s942_s5  ;;  %325 = vmatpush.msra.mxu0 %v1289_v5  ;;  %v365_v24 = vand.u32 4294901760, %v1305_v15  ;;  %v371_v25 = vand.u32 4294901760, %v1308_v16  ;;  %v1331_v26 = vsub.f32 %v316_v12, %v1310_v17  ;;  %466 = vmatpush.msra.mxu2 %v1305_v15  ;;  %v1337_v29 = vsub.f32 %v315_v13, %v1312_v18  ;;  %v308_v56 = vld [vmem:[%s1266_s7 + $0x10] sm:$0xff]  ;;  %v307_v62 = vld [vmem:[%s1266_s7 + $0x8] sm:$0xff]  ;;  %v306_v7 = vld [vmem:[%s1266_s7] sm:$0xff]  ;;  %s293_s14 = scalar_lea.vmem %s1615_s0, %s942_s5 }
  0x28   : > { %v1282_v0 = vld [vmem:[%s300_s27] sm:$0xff]  ;;  %v377_v27 = vand.u32 4294901760, %v1315_v19  ;;  %v383_v28 = vand.u32 4294901760, %v1318_v20  ;;  %521 = vmatpush.msra.mxu3 %v1289_v5  ;;  %v389_v32 = vand.u32 4294901760, %v1321_v21  ;;  %v1348_v33 = vand.u32 4294901760, %v313_v23  ;;  %s1563_s6 = scalar_lea.vmem %s1618_s3, %s944_s21  ;;  %s941_s7 = sshll.u32 %s1262_s24, 3 }
  0x29   : > { %v722_v3 = vmul.f32 0.5, %v1282_v0  ;;  %v366_v30 = vsub.f32 %v1305_v15, %v365_v24  ;;  %327 = vmatpush.msra.mxu0 %v1294_v9  ;;  %v372_v31 = vsub.f32 %v1308_v16, %v371_v25  ;;  %469 = vmatpush.msra.mxu2 %v1308_v16  ;;  %v1355_v35 = vsub.f32 %v314_v14, %v1323_v22  ;;  %s946_s25 = sshll.u32 %s1145_s18, 3  ;;  %s286_s27 = scalar_lea.vmem [#allocation5], %s941_s7 }
  0x2a   : > { %v378_v34 = vsub.f32 %v1315_v19, %v377_v27  ;;  %523 = vmatpush.msra.mxu3 %v1294_v9  ;;  %v384_v39 = vsub.f32 %v1318_v20, %v383_v28  ;;  %v395_v40 = vand.u32 4294901760, %v1331_v26  ;;  %v401_v42 = vand.u32 4294901760, %v1337_v29  ;;  %s806_s9 = scalar_lea.hbm %s1619_s4, %s946_s25  ;;  %s795_s18 = scalar_lea.sflag [#allocation4], %s1262_s24 }
  0x2b   : > { %724 = vrot.lane.b32.xlu0 %v722_v3, %s1157_s10  ;;  %v367_v37 = vand.u32 4294901760, %v366_v30  ;;  %v373_v38 = vand.u32 4294901760, %v372_v31  ;;  %329 = vmatpush.msra.mxu0 %v1296_v10  ;;  %v390_v45 = vsub.f32 %v1321_v21, %v389_v32  ;;  %v1373_v46 = vand.u32 4294901760, %v312_v36  ;;  %s808_s10 = sshll.u32 %s286_s27, 4  ;;  %s809_s10 = int_to_ptr.vmem [resolvable:$true] %s808_s10 }
  0x2c   : > { %472 = vmatpush.msra.mxu2 %v1315_v19  ;;  %525 = vmatpush.msra.mxu3 %v1296_v10  ;;  %v379_v44 = vand.u32 4294901760, %v378_v34  ;;  %v1376_v47 = vsub.f32 %v313_v23, %v1348_v33  ;;  %v407_v48 = vand.u32 4294901760, %v1355_v35  ;;  %v1379_v49 = vand.u32 4294901760, %v311_v41 }
  0x2d   : > { %368 = vmatpush.msra.mxu1 %v367_v37  ;;  %331 = vmatpush.msra.mxu0 %v1298_v11  ;;  %v385_v51 = vand.u32 4294901760, %v384_v39  ;;  %v396_v52 = vsub.f32 %v1331_v26, %v395_v40  ;;  %v1389_v53 = vsub.f32 %v312_v36, %v1373_v46  ;;  %v1391_v54 = vand.u32 4294901760, %v310_v43 }
  0x2e   : > { %475 = vmatpush.msra.mxu2 %v1318_v20  ;;  %v402_v55 = vsub.f32 %v1337_v29, %v401_v42  ;;  %527 = vmatpush.msra.mxu3 %v1298_v11  ;;  %v391_v57 = vand.u32 4294901760, %v390_v45  ;;  %v413_v58 = vand.u32 4294901760, %v1376_v47  ;;  %v1402_v59 = vsub.f32 %v311_v41, %v1379_v49 }
  0x2f   : > { %374 = vmatpush.msra.mxu1 %v373_v38  ;;  %333 = vmatpush.msra.mxu0 %v1310_v17  ;;  %v1404_v60 = vand.u32 4294901760, %v309_v50  ;;  %v408_v61 = vsub.f32 %v1355_v35, %v407_v48  ;;  %v397_v63 = vand.u32 4294901760, %v396_v52  ;;  %v419_v1 = vand.u32 4294901760, %v1389_v53 }
  0x30   : > { %478 = vmatpush.msra.mxu2 %v1321_v21  ;;  %529 = vmatpush.msra.mxu3 %v1310_v17  ;;  %v1415_v2 = vsub.f32 %v310_v43, %v1391_v54  ;;  %v1417_v3 = vand.u32 4294901760, %v308_v56  ;;  %v403_v6 = vand.u32 4294901760, %v402_v55  ;;  %v414_v8 = vsub.f32 %v1376_v47, %v413_v58 }
  0x31   : > { %380 = vmatpush.msra.mxu1 %v379_v44  ;;  %335 = vmatpush.msra.mxu0 %v1312_v18  ;;  %v425_v12 = vand.u32 4294901760, %v1402_v59  ;;  %v1428_v13 = vsub.f32 %v309_v50, %v1404_v60  ;;  %v1430_v14 = vand.u32 4294901760, %v307_v62  ;;  %v409_v23 = vand.u32 4294901760, %v408_v61 }
  0x32   : > { %481 = vmatpush.msra.mxu2 %v1331_v26  ;;  %531 = vmatpush.msra.mxu3 %v1312_v18  ;;  %v420_v30 = vsub.f32 %v1389_v53, %v419_v1  ;;  %v431_v31 = vand.u32 4294901760, %v1415_v2  ;;  %v1440_v34 = vsub.f32 %v308_v56, %v1417_v3  ;;  %v1442_v36 = vand.u32 4294901760, %v306_v7  ;;  %v305_v56 = vld [vmem:[%s293_s14] sm:$0xff] }
  0x33   : > { %735 = vrot.lane.b32.xlu0 %v1282_v0, %s1158_s11  ;;  %386 = vmatpush.msra.mxu1 %v385_v51  ;;  %v415_v37 = vand.u32 4294901760, %v414_v8  ;;  %v426_v38 = vsub.f32 %v1402_v59, %v425_v12  ;;  %v437_v39 = vand.u32 4294901760, %v1428_v13  ;;  %v1452_v41 = vsub.f32 %v307_v62, %v1430_v14  ;;  %s810_s11 = sshll.u32 %s806_s9, 4  ;;  %s811_s11 = int_to_ptr.hbm [resolvable:$true] %s810_s11 }
  0x34   : > { %337 = vmatpush.msra.mxu0 %v1323_v22  ;;  %484 = vmatpush.msra.mxu2 %v1337_v29  ;;  %v421_v43 = vand.u32 4294901760, %v420_v30  ;;  %v432_v44 = vsub.f32 %v1415_v2, %v431_v31  ;;  %v443_v45 = vand.u32 4294901760, %v1440_v34  ;;  %v1462_v50 = vsub.f32 %v306_v7, %v1442_v36  ;;  %s1085_s12 = sshra.s32 %s811_s11, 4  ;;  %s1086_s12 = int_to_ptr.hbm [resolvable:$true] %s1085_s12 }
  0x35   : > { %392 = vmatpush.msra.mxu1 %v391_v57  ;;  %533 = vmatpush.msra.mxu3 %v1323_v22  ;;  %v427_v51 = vand.u32 4294901760, %v426_v38  ;;  %v438_v52 = vsub.f32 %v1428_v13, %v437_v39  ;;  %v449_v55 = vand.u32 4294901760, %v1452_v41  ;;  %s1087_s13 = scalar_lea.hbm %s1086_s12, 8  ;;  %p1092_p8 = scmp.lt.s32.totalorder %s1086_s12, %s1619_s4 }
  0x36   : > { %339 = vmatpush.msra.mxu0 %v1348_v33  ;;  %487 = vmatpush.msra.mxu2 %v1355_v35  ;;  %v433_v57 = vand.u32 4294901760, %v432_v44  ;;  %v444_v61 = vsub.f32 %v1440_v34, %v443_v45  ;;  %v455_v62 = vand.u32 4294901760, %v1462_v50  ;;  %p1088_p5 = scmp.ne.s32.totalorder %s1086_s12, %s1087_s13  ;;  %p1093_p10 = scmp.lt.s32.totalorder %s1091_s22, %s1087_s13 }
  0x37   : > { %398 = vmatpush.msra.mxu1 %v397_v63  ;;  %535 = vmatpush.msra.mxu3 %v1348_v33  ;;  %v1483_v63 = vand.u32 4294901760, %v305_v56  ;;  %v450_v7 = vsub.f32 %v1452_v41, %v449_v55 }
  0x38   : > { %341 = vmatpush.msra.mxu0 %v1373_v46  ;;  %490 = vmatpush.msra.mxu2 %v1376_v47  ;;  %v456_v30 = vsub.f32 %v1462_v50, %v455_v62  ;;  %p1089_p6 = pnand %p1088_p5, %p1239_p9  ;;  %p1094_p13 = por %p1093_p10, %p1092_p8 }
  0x39   : > { %404 = vmatpush.msra.mxu1 %v403_v6  ;;  %537 = vmatpush.msra.mxu3 %v1373_v46  ;;  %v439_v6 = vand.u32 4294901760, %v438_v52  ;;  %v355_v8 = vsub.f32 %v305_v56, %v1483_v63  ;;  %v451_v38 = vand.u32 4294901760, %v450_v7 }
  0x3a   : > { %343 = vmatpush.msra.mxu0 %v1379_v49  ;;  %493 = vmatpush.msra.mxu2 %v1389_v53  ;;  %v457_v44 = vand.u32 4294901760, %v456_v30  ;;  %v1028_v30 = vld [vmem:[%s1563_s6 + $0x3] ss:$0 sm:$0xff]  ;;  %p1090_p7 = pneg %p1089_p6 }
  0x3b   : > { %410 = vmatpush.msra.mxu1 %v409_v23  ;;  %539 = vmatpush.msra.mxu3 %v1379_v49  ;;  %v445_v23 = vand.u32 4294901760, %v444_v61 }
  0x3c   : > { %345 = vmatpush.msra.mxu0 %v1391_v54  ;;  %496 = vmatpush.msra.mxu2 %v1402_v59  ;;  %p1095_p0 = pnand %p1094_p13, %p1090_p7 }
  0x3d   : > { %416 = vmatpush.msra.mxu1 %v415_v37  ;;  %541 = vmatpush.msra.mxu3 %v1391_v54  ;;  %v356_v37 = vand.u32 4294901760, %v355_v8 }
  0x3e   : > { %347 = vmatpush.msra.mxu0 %v1404_v60  ;;  %499 = vmatpush.msra.mxu2 %v1415_v2 }
  0x3f   : > { %422 = vmatpush.msra.mxu1 %v421_v43  ;;  %543 = vmatpush.msra.mxu3 %v1404_v60  ;;  %v357_v43 = vsub.f32 %v355_v8, %v356_v37 }
  0x40   : > { %349 = vmatpush.msra.mxu0 %v1417_v3  ;;  %502 = vmatpush.msra.mxu2 %v1428_v13 }
  0x41   : > { %428 = vmatpush.msra.mxu1 %v427_v51  ;;  %545 = vmatpush.msra.mxu3 %v1417_v3  ;;  %v358_v51 = vand.u32 4294901760, %v357_v43 }
  0x42   : > { %351 = vmatpush.msra.mxu0 %v1430_v14  ;;  %505 = vmatpush.msra.mxu2 %v1440_v34 }
  0x43   : > { %434 = vmatpush.msra.mxu1 %v433_v57  ;;  %547 = vmatpush.msra.mxu3 %v1430_v14 }
  0x44   : > { %353 = vmatpush.msra.mxu0 %v1442_v36  ;;  %508 = vmatpush.msra.mxu2 %v1452_v41 }
  0x45   : > { %440 = vmatpush.msra.mxu1 %v439_v6  ;;  %549 = vmatpush.msra.mxu3 %v1442_v36 }
  0x46   : > { %560 = vmatpush.msrb.mxu0 %v365_v24  ;;  %511 = vmatpush.msra.mxu2 %v1462_v50 }
  0x47   : > { %446 = vmatpush.msra.mxu1 %v445_v23  ;;  %514 = vmatmul.f32.vlgmr.msra.gmra.mxu2 %v355_v8 }
  0x48   : > { %564 = vmatpush.msrb.mxu0 %v371_v25  ;;  %553 = vmatmul.f32.vlgmr.msra.gmra.mxu3 %v356_v37 }
  0x49   : > { %452 = vmatpush.msra.mxu1 %v451_v38  ;;  %359 = vmatmul.f32.vlgmr.msra.gmra.mxu0 %v358_v51 }
  0x4a   : > { %568 = vmatpush.msrb.mxu0 %v377_v27 }
  0x4b   : > { %458 = vmatpush.msra.mxu1 %v457_v44 }
  0x4c   : > { %572 = vmatpush.msrb.mxu0 %v383_v28  ;;  %460 = vmatmul.f32.vlgmr.msra.gmra.mxu1 %v1483_v63 }
  0x4d   : > { %627 = vmatpush.msrb.mxu1 %v1287_v4  ;;  %v1159_v4 = vmov 1  }
  0x4e   : > { %576 = vmatpush.msrb.mxu0 %v389_v32  ;;  %1023 = vset.pattern.permute.xlu2 %v1159_v4 }
  0x4f   : > { %629 = vmatpush.msrb.mxu1 %v1289_v5  ;;  %v1160_v5 = vmov 0  }
  0x50   : > { %580 = vmatpush.msrb.mxu0 %v395_v40  ;;  %1020 = vset.pattern.permute.xlu1 %v1160_v5 }
  0x51   : > { %631 = vmatpush.msrb.mxu1 %v1294_v9  ;;  %v1161_v9 = vmov 2  }
  0x52   : > { %584 = vmatpush.msrb.mxu0 %v401_v42  ;;  %1021 = vset.pattern.permute.xlu0 %v1161_v9 }
  0x53   : > { %633 = vmatpush.msrb.mxu1 %v1296_v10  ;;  %707 = vperm.xlu0 %1021, %v1282_v0  }
  0x54   : > { %588 = vmatpush.msrb.mxu0 %v407_v48  ;;  %v687_v48 = vld [vmem:[%s1563_s6 + $0x1] sm:$0x1] }
  0x55   : > { %635 = vmatpush.msrb.mxu1 %v1298_v11 }
  0x56   : > { %592 = vmatpush.msrb.mxu0 %v413_v58 }
  0x57   : > { %637 = vmatpush.msrb.mxu1 %v1310_v17 }
  0x58   : > { %596 = vmatpush.msrb.mxu0 %v419_v1 }
  0x59   : > { %639 = vmatpush.msrb.mxu1 %v1312_v18  ;;  %v1162_v18 = vmov 3  }
  0x5a   : > { %600 = vmatpush.msrb.mxu0 %v425_v12 }
  0x5b   : > { %641 = vmatpush.msrb.mxu1 %v1323_v22 }
  0x5c   : > { %604 = vmatpush.msrb.mxu0 %v431_v31 }
  0x5d   : > { %643 = vmatpush.msrb.mxu1 %v1348_v33 }
  0x5e   : > { %608 = vmatpush.msrb.mxu0 %v437_v39 }
  0x5f   : > { %645 = vmatpush.msrb.mxu1 %v1373_v46  ;;  %v688_v46 = vld [vmem:[%s1563_s6 + $0x2] sm:$0x1] }
  0x60   : > { %612 = vmatpush.msrb.mxu0 %v443_v45  ;;  %v729_v53 = vmul.f32 0.5, %v688_v46 }
  0x61   : > { %647 = vmatpush.msrb.mxu1 %v1379_v49 }
  0x62   : > { %616 = vmatpush.msrb.mxu0 %v449_v55 }
  0x63   : > { %649 = vmatpush.msrb.mxu1 %v1391_v54  ;;  %v686_v54 = vld [vmem:[%s1563_s6] sm:$0x1] }
  0x64   : > { %620 = vmatpush.msrb.mxu0 %v455_v62  ;;  %v733_v2 = vadd.f32 %v729_v53, %v686_v54 }
  0x65   : > { %622 = vmatmul.f32.vlgmr.msrb.gmra.mxu0 %v1483_v63  ;;  %651 = vmatpush.msrb.mxu1 %v1404_v60 }
  0x66   : > { %v745_v34 = vperm.slane %v733_v2, 0 }
  0x67   : > { %653 = vmatpush.msrb.mxu1 %v1417_v3  ;;  %v730_v3 = vsub.f32 %v686_v54, %v729_v53 }
  0x69   : > { %655 = vmatpush.msrb.mxu1 %v1430_v14 }
  0x6b   : > { %657 = vmatpush.msrb.mxu1 %v1442_v36  ;;  %v752_v36 = vperm.slane %v730_v3, 0 }
  0x6c   : > { %659 = vmatmul.f32.vlgmr.msrb.gmra.mxu1 %v1483_v63  ;;  %v1027_v63 = vld [vmem:[%s1563_s6 + $0x2] ss:$0 sm:$0xff] }
  0x9d   : > { %v725_v10 = vpop.permute.xlu0 %724 }
  0x9e   : > { %v728_v11 = vadd.f32 %v725_v10, %v1282_v0  ;;  %v727_v15 = vsub.f32 %v1282_v0, %v725_v10 }
  0xa0   : > { %756 = vperm.xlu2 %1023, %v728_v11   ;;  %742 = vperm.xlu1 %1020, %v728_v11  }
  0xa5   : > { %v736_v16 = vpop.permute.xlu0 %735 }
  0xa6   : > { %v738_v17 = vmul.f32 %v736_v16, %v1282_v0 }
  0xa8   : > { %762 = vperm.xlu2 %1023, %v727_v15   ;;  %749 = vperm.xlu1 %1020, %v727_v15   ;;  %v1030_v15 = vld [vmem:[%s1563_s6 + $0x1] ss:$0 sm:$0xff] }
  0xb0   : > { %1022 = vset.pattern.permute.xlu1 %v1162_v18  ;;  %1024 = vset.pattern.permute.xlu2 %v1161_v9 }
  0xb1   : > { %715 = vperm.xlu1 %1022, %v1282_v0   ;;  %773 = vperm.xlu2 %1024, %v738_v17  }
  0xb9   : > { %1025 = vset.pattern.permute.xlu1 %v1160_v5  ;;  %1026 = vset.pattern.permute.xlu2 %v1159_v4 }
  0xba   : > { %692 = vperm.xlu1 %1025, %v1282_v0   ;;  %699 = vperm.xlu2 %1026, %v1282_v0   ;;  %v689_v0 = vld [vmem:[%s1563_s6 + $0x3] sm:$0x1] }
  0xbb   : > { %v731_v47 = vmul.f32 0.5, %v689_v0  ;;  %v739_v39 = vmul.f32 %v689_v0, %v688_v46 }
  0xbd   : > { %v732_v49 = vsub.f32 %v687_v48, %v731_v47  ;;  %v734_v59 = vadd.f32 %v731_v47, %v687_v48  ;;  %v776_v56 = vperm.slane %v739_v39, 0 }
  0xbf   : > { %v765_v1 = vperm.slane %v732_v49, 0  ;;  %v759_v14 = vperm.slane %v734_v59, 0 }
  0xc5   : > { %v708_v8 = vpop.permute.xlu0 %707 }
  0xc6   : > { %v360_v20 = vpop.f32.mrf.mxu0  ;;  %v781_v44 = vadd.f32 %v1027_v63, %v708_v8 }
  0xc9   : > { %v461_v19 = vpop.f32.mrf.mxu1 }
  0xca   : > { %v462_v21 = vadd.f32 %v461_v19, %v360_v20  ;;  %v515_v22 = vpop.f32.mrf.mxu2 }
  0xcb   : > { %v554_v25 = vpop.f32.mrf.mxu3 }
  0xcc   : > { %v516_v24 = vadd.f32 %v515_v22, %v462_v21 }
  0xce   : > { %v555_v26 = vadd.f32 %v554_v25, %v516_v24  ;;  %v1029_v25 = vld [vmem:[%s1563_s6] ss:$0 sm:$0xff] }
  0xe2   : > { %v623_v27 = vpop.f32.mrf.mxu0 }
  0xe3   : > { %v624_v28 = vadd.f32 %v623_v27, %v555_v26 }
  0xe9   : > { %v660_v29 = vpop.f32.mrf.mxu1 }
  0xea   : > { %v1556_v32 = vadd.f32 %v660_v29, %v624_v28  ;;  %v711_v29 = vsub.f32 %v708_v8, %v1027_v63 }
  0xec   : > { %v663_v33 = vand.u32 2147483647, %v1556_v32  ;;  %vm670_vm0 = vcmp.ge.f32.partialorder %v1556_v32, 0.0  ;;  %v673_v4 = vmax.f32 %v1556_v32, 0.0  ;;  %v712_v54 = vand.u32 2147483647, %v711_v29 }
  0xee   : > { %v664_v35 = vsub.f32 0.0, %v663_v33 }
  0xf0   : > { %v665_v40 = vmul.f32 1.442695, %v664_v35 }
  0xf2   : > { %1031 = vpow2.f32 %v665_v40 }
  0xf8   : > { %v1032_v58 = vpop.eup %1031 }
  0xf9   : > { %v667_v12 = vadd.f32 1.0, %v1032_v58 }
  0xfa   : > { %v757_v42 = vpop.permute.xlu2 %756 }
  0xfb   : > { %1033 = vrcp.f32 %v667_v12  ;;  %v760_v41 = vmin.f32 %v757_v42, %v759_v14 }
  0xfc   : > { %1035 = vlog2.f32 %v667_v12 }
 0x101   : > { %v1034_v62 = vpop.eup %1033 }
 0x102   : > { %v763_v13 = vpop.permute.xlu2 %762  ;;  %v1036_v37 = vpop.eup %1035  ;;  %v669_v38 = vmul.f32 %v1034_v62, %v1032_v58 }
 0x103   : > { %v766_v31 = vmax.f32 %v763_v13, %v765_v1  ;;  %v675_v5 = vmul.f32 0.6931472, %v1036_v37 }
 0x104   : > { %v672_v11 = vsel %vm670_vm0, %v669_v38, %v1034_v62  ;;  %v671_v16 = vsel %vm670_vm0, %v1034_v62, %v669_v38 }
 0x105   : > { %v767_v50 = vsub.f32 %v760_v41, %v766_v31  ;;  %v676_v20 = vadd.f32 %v675_v5, %v673_v4  ;;  %v679_v21 = vmul.f32 %v672_v11, %v672_v11  ;;  %v678_v24 = vmul.f32 %v671_v16, %v671_v16 }
 0x107   : > { %v769_v6 = vmax.f32 %v767_v50, 0.0  ;;  %v677_v27 = vsub.f32 %v676_v20, %v1556_v32  ;;  %v680_v28 = vmul.f32 0.25, %v679_v21  ;;  %v682_v35 = vmul.f32 0.75, %v678_v24 }
 0x109   : > { %v681_v53 = vmul.f32 %v680_v28, %v677_v27  ;;  %v683_v58 = vmul.f32 %v682_v35, %v676_v20 }
 0x10b   : > { %v774_v61 = vpop.permute.xlu2 %773  ;;  %v684_v12 = vsub.f32 %v681_v53, %v683_v58 }
 0x10c   : > { %v777_v23 = vadd.f32 %v776_v56, %v774_v61 }
 0x112   : > { %v743_v60 = vpop.permute.xlu1 %742 }
 0x113   : > { %v746_v52 = vmin.f32 %v743_v60, %v745_v34 }
 0x114   : > { %v700_v19 = vpop.permute.xlu2 %699 }
 0x115   : > { %v703_v26 = vsub.f32 %v700_v19, %v1030_v15 }
 0x117   : > { %v704_v0 = vand.u32 2147483647, %v703_v26 }
 0x11a   : > { %v750_v45 = vpop.permute.xlu1 %749 }
 0x11b   : > { %v753_v55 = vmax.f32 %v750_v45, %v752_v36 }
 0x11d   : > { %v754_v57 = vsub.f32 %v746_v52, %v753_v55 }
 0x11f   : > { %v768_v7 = vmax.f32 %v754_v57, 0.0  ;;  %v782_v17 = vsub.f32 %v781_v44, %v754_v57 }
 0x121   : > { %v770_v43 = vmul.f32 %v769_v6, %v768_v7 }
 0x123   : > { %v716_v51 = vpop.permute.xlu1 %715  ;;  %v778_v9 = vsub.f32 %v777_v23, %v770_v43 }
 0x124   : > { %v783_v10 = vadd.f32 %v1028_v30, %v716_v51  ;;  %v719_v46 = vsub.f32 %v716_v51, %v1028_v30 }
 0x125   : > { %1037 = vrcp.f32 %v778_v9 }
 0x126   : > { %v784_v18 = vsub.f32 %v783_v10, %v767_v50  ;;  %v720_v32 = vand.u32 2147483647, %v719_v46 }
 0x128   : > { %v785_v22 = vmul.f32 %v784_v18, %v782_v17 }
 0x12a   : > { %1039 = vrcp.f32 %v785_v22  ;;  %v786_v47 = vsub.f32 %v785_v22, %v778_v9 }
 0x12b   : > { %v1038_v42 = vpop.eup %1037 }
 0x12c   : > { %v693_v33 = vpop.permute.xlu1 %692  ;;  %v780_v59 = vmul.f32 %v1038_v42, %v770_v43 }
 0x12d   : > { %v696_v40 = vsub.f32 %v693_v33, %v1029_v25 }
 0x12f   : > { %v697_v48 = vand.u32 2147483647, %v696_v40 }
 0x130   : > { %v1040_v49 = vpop.eup %1039 }
 0x131   : > { %v788_v60 = vmul.f32 %v1040_v49, %v786_v47  ;;  %v705_v1 = vadd.f32 %v704_v0, %v697_v48 }
 0x133   : > { %v789_v2 = vsub.f32 %v780_v59, %v788_v60  ;;  %v713_v3 = vadd.f32 %v712_v54, %v705_v1 }
 0x135   : > { %v721_v13 = vadd.f32 %v720_v32, %v713_v3  ;;  %v790_v31 = vsub.f32 0.0, %v789_v2 }
 0x137   : > { %v791_v14 = vadd.f32 %v721_v13, %v684_v12 }
 0x139   : > { %v792_v34 = vadd.f32 %v791_v14, %v790_v31 }
 0x13b   : > { %793 = vst [vmem:[%s286_s27] sm:$0xff] %v792_v34 }
 0x13c   : > { %1098 = shalt.err (!%p1095_p0)
}
 0x13d   : > { %952 = dma.vmem_to_hbm [thread:$0]  (%p1239_p9), %s809_s10, 128, %s811_s11, %s795_s18  }
 0x13e PF: > { %s822_s24 = sand.u32 1, %s1133_s15   ;;  %p959_p1 = pnand %p935_p12, %p1246_p11 }
 0x13f   : > { %s823_s7 = scalar_lea.sflag [#allocation4], %s822_s24 }
 0x140   : > { %p960_p2 = pneg %p959_p1 }
 0x142   : > { %1128 = dma.done.wait (%p960_p2), %s823_s7, 128  }
 0x143   : > { %1130 = vsyncadd (%p960_p2), %s823_s7, 4294967168  ;;  %s20_s20 = sadd.s32 1, %s1153_s20   ;;  %s1624_s15 = smov %s1137_s16 }
 0x144   : > { %p17_p3 = scmp.ge.s32.totalorder %s20_s20, 4   ;;  %s1625_s16 = smov %s1141_s17 }
 0x145   : > { %s1626_s17 = smov %s1244_s29  ;;  %s1627_s18 = smov %s1149_s19 }
 0x146   : > { %s1628_s19 = smov %s1630_s23  ;;  %19 = sbr.rel (!%p17_p3) target bundleno = 6 (0x6), region = 90 }
 0x14b   :  { %829 = vsyncpa [#allocation3], 1 }
 0x14c   :  { %831 = vsyncpa [#allocation3 + $0x1], 1 }
 0x14d   :  { %832 = vsyncpa [#allocation4], 1 }
 0x14e   :  { %834 = vsyncpa [#allocation4 + $0x1], 1 }

</bundles_post_ra>
